<compile_context>
chip_gen: v5e
topology: v5e:2x2
jax: 0.10.0
libtpu: 0.0.40
codegen_flags: <defaults>
</compile_context>

<pallas_src>
import math

import numpy as np
import jax
import jax.numpy as jnp
from jax.experimental import pallas as pl
from jax.experimental.pallas import tpu as pltpu

LN_EPS = 1e-5  # torch.nn.LayerNorm default eps


# ---------------------------------------------------------------------------
# Parameter packing / context hoisting (plain-JAX glue, runs once per call)
# ---------------------------------------------------------------------------
def pack_params(p, D, mm_dtype):
    """Transpose the in-kernel weights to (in, out), keep only the cc_norm half
    of the first pseudo_weights Linear (the context half is hoisted), and pack
    every bias / LayerNorm vector into a single (8, 2D) f32 slab."""
    D2 = 2 * D
    gamma, beta = p["norm"]
    W1, b1 = p["pw1"]             # (2D, 2D), (2D,)
    W2, b2 = p["pw2"]             # (2D, 2D), (2D,)
    W3, b3 = p["pw3"]             # (D, 2D), (D,)

    w1xT = W1[:, D:].T.astype(mm_dtype)   # (D, 2D)  cc_norm half of layer 1
    w2T = W2.T.astype(mm_dtype)           # (2D, 2D)
    w3T = W3.T.astype(mm_dtype)           # (2D, D)

    def pad(v):
        return jnp.zeros((D2,), jnp.float32).at[: v.shape[0]].set(v)

    zeros = jnp.zeros((D2,), jnp.float32)
    bias_slab = jnp.stack(
        [pad(gamma), pad(beta), pad(b1), pad(b2), pad(b3), zeros, zeros, zeros],
        axis=0,
    )                             # (8, 2D) f32 -> a single VMEM tile
    return (w1xT, w2T, w3T), bias_slab


def compute_ctx_h1(p, S, S_pad, D):
    """Batch-independent context net, hoisted out of the kernel:
    ctx_h1[s] = context_net([sin, cos](s)) @ W1[:, :D].T  (no bias: b1 is folded
    into the cc_norm half inside the kernel).  Rows padded to S_pad (mult of 8)."""
    Wc1, bc1 = p["ctx1"]
    Wc2, bc2 = p["ctx2"]
    W1, _ = p["pw1"]
    hp = jax.lax.Precision.HIGHEST
    ang = jnp.arange(S, dtype=jnp.float32) * (2.0 * jnp.pi / S)
    cv = jnp.stack([jnp.sin(ang), jnp.cos(ang)], axis=1)                   # (S, 2)
    ctx_h = jnp.maximum(jnp.dot(cv, Wc1.T, precision=hp) + bc1, 0.0)       # (S, D)
    context = jnp.dot(ctx_h, Wc2.T, precision=hp) + bc2                    # (S, D)
    ctx_h1 = jnp.dot(context, W1[:, :D].T, precision=hp)                   # (S, 2D)
    return jnp.zeros((S_pad, 2 * D), jnp.float32).at[:S, :].set(ctx_h1)


def _pick_tb(B, C, target_rows=1024):
    """TB must be a multiple-of-8 proper divisor of B (so the (TB*C, D) input
    block and the (TB, S*D) output block are (8,128)-aligned) or TB == B
    (full-array blocks).  Prefer proper divisors so the grid has >= 2 steps
    (both v7x TensorCores get work) with M = TB*C near `target_rows`."""
    cap = max(1, target_rows // max(C, 1))
    divs = [d for d in range(8, B, 8) if B % d == 0]
    good = [d for d in divs if d <= cap]
    if good:
        return max(good)
    if divs:
        return min(divs)
    return B                      # tiny batch: single full-block grid step


# ---------------------------------------------------------------------------
# Pallas kernel
# ---------------------------------------------------------------------------
def build_kernel(S, S_pad, D, C, TB, mm_dtype):
    M = TB * C
    D2 = 2 * D

    def kernel(x_ref, ctx_ref, w1x_ref, w2_ref, w3_ref, bias_ref, out_ref):
        f32 = jnp.float32

        def mm(a, w):
            return jnp.dot(a.astype(mm_dtype), w, preferred_element_type=f32)

        # --- hoist every parameter load (once per grid step) ---------------
        w1x = w1x_ref[...]                       # (D, 2D)   mm_dtype
        w2 = w2_ref[...]                         # (2D, 2D)  mm_dtype
        w3 = w3_ref[...]                         # (2D, D)   mm_dtype
        ctx_h1 = ctx_ref[...]                    # (S_pad, 2D) f32 (precomputed)
        P = bias_ref[...]                        # (8, 2D) f32 bias / LN slab
        gamma, beta = P[0:1, :D], P[1:2, :D]
        b1, b2, b3 = P[2:3, :], P[3:4, :], P[4:5, :D]

        # --- LayerNorm over the flattened (batch, cluster) rows -------------
        x = x_ref[...]                           # (M, D) f32 raw cluster centers
        mu = jnp.mean(x, axis=-1, keepdims=True)
        cen = x - mu
        var = jnp.mean(cen * cen, axis=-1, keepdims=True)
        cc_norm = cen * jax.lax.rsqrt(var + LN_EPS) * gamma + beta

        # cc_norm half of pseudo_weights layer 1 (concat folded; b1 folded here)
        cc_h1 = mm(cc_norm, w1x) + b1            # (M, 2D)

        # --- batch ALL slots into the MXU M dimension -----------------------
        # rows ordered (m, s): (M, S_pad, 2D) -> (M*S_pad, 2D) is layout-free
        h1 = jnp.maximum(cc_h1[:, None, :] + ctx_h1[None, :, :], 0.0)
        h1 = h1.reshape(M * S_pad, D2)
        h2 = jnp.maximum(mm(h1, w2) + b2, 0.0)                      # (M*S_pad, 2D)
        h3 = mm(h2, w3) + b3                                        # (M*S_pad, D)

        # sigmoid: exp (EUP) + approximate reciprocal (EUP) - no true divide
        pw = pl.reciprocal(1.0 + jnp.exp(-h3), approx=True)

        # --- weight raw centers, sum over the C clusters (VPU adds) ---------
        pw3 = pw.reshape(M, S_pad, D)
        contrib = (pw3 * x[:, None, :]).reshape(TB, C * S_pad, D)
        acc = contrib[:, :S_pad, :]
        for c in range(1, C):                    # static unroll, C-1 cheap adds
            acc = acc + contrib[:, c * S_pad:(c + 1) * S_pad, :]

        # lane-dense (TB, S*D) store (drop any padded slot rows)
        out_ref[...] = jnp.concatenate(
            [acc[:, s, :] for s in range(S)], axis=-1).astype(out_ref.dtype)

    return kernel


# ---------------------------------------------------------------------------
# Wrapper
# ---------------------------------------------------------------------------
def slot_init_pseudo_weights(cluster_centers, params, num_slots, *,
                             mm_dtype=jnp.bfloat16, target_rows=1024):
    """cluster_centers: (B, C, D) f32 -> slots (B, num_slots, D) f32.
    mm_dtype=bfloat16 (default, recommended on every TPU generation): bf16 MXU
    operands with f32 accumulation / LayerNorm / sigmoid.  Pass jnp.float32 for
    the tightest accuracy."""
    B, C, D = cluster_centers.shape
    S = num_slots
    S_pad = ((S + 7) // 8) * 8
    (w1x, w2, w3), bias_slab = pack_params(params, D, mm_dtype)
    ctx_h1 = compute_ctx_h1(params, S, S_pad, D)

    TB = _pick_tb(B, C, target_rows)
    M = TB * C
    grid = (B // TB,)
    x_flat = cluster_centers.reshape(B * C, D).astype(jnp.float32)

    def const_spec(a):
        nd = a.ndim
        return pl.BlockSpec(a.shape, lambda i, _n=nd: (0,) * _n)

    in_specs = [pl.BlockSpec((M, D), lambda i: (i, 0)),        # cluster centers
                const_spec(ctx_h1), const_spec(w1x), const_spec(w2),
                const_spec(w3), const_spec(bias_slab)]
    out_spec = pl.BlockSpec((TB, S * D), lambda i: (i, 0))     # lane-dense slots

    out = pl.pallas_call(
        build_kernel(S, S_pad, D, C, TB, mm_dtype),
        out_shape=jax.ShapeDtypeStruct((B, S * D), jnp.float32),
        grid=grid,
        in_specs=in_specs,
        out_specs=out_spec,
        compiler_params=pltpu.CompilerParams(
            dimension_semantics=("parallel",),
            vmem_limit_bytes=48 * 1024 * 1024),
    )(x_flat, ctx_h1, w1x, w2, w3, bias_slab)
    return out.reshape(B, S, D)


# ---------------------------------------------------------------------------
# Deterministic parameter init (shapes from the PyTorch __init__)
# ---------------------------------------------------------------------------
def init_params(key, D):
    ks = iter(jax.random.split(key, 12))

    def lin(out_f, in_f):
        bound = 1.0 / math.sqrt(in_f)
        W = jax.random.uniform(next(ks), (out_f, in_f), jnp.float32, -bound, bound)
        b = jax.random.uniform(next(ks), (out_f,), jnp.float32, -bound, bound)
        return W, b

    return {
        "norm": (jnp.ones((D,), jnp.float32), jnp.zeros((D,), jnp.float32)),
        "ctx1": lin(D, 2),
        "ctx2": lin(D, D),
        "pw1": lin(2 * D, 2 * D),
        "pw2": lin(2 * D, 2 * D),
        "pw3": lin(D, 2 * D),
    }


# ---------------------------------------------------------------------------
# Pure-JAX reference (mirrors the PyTorch forward)
# ---------------------------------------------------------------------------
def forward_ref(cc, p, S):
    B, C, D = cc.shape
    gamma, beta = p["norm"]
    Wc1, bc1 = p["ctx1"]
    Wc2, bc2 = p["ctx2"]
    W1, b1 = p["pw1"]
    W2, b2 = p["pw2"]
    W3, b3 = p["pw3"]

    mu = cc.mean(-1, keepdims=True)
    var = ((cc - mu) ** 2).mean(-1, keepdims=True)
    cc_norm = (cc - mu) / jnp.sqrt(var + LN_EPS) * gamma + beta

    ang = jnp.arange(S, dtype=jnp.float32) * (2.0 * jnp.pi / S)
    cv = jnp.stack([jnp.sin(ang), jnp.cos(ang)], axis=1)                 # (S, 2)
    context = jnp.maximum(cv @ Wc1.T + bc1, 0.0) @ Wc2.T + bc2           # (S, D)

    ctx_b = jnp.broadcast_to(context[None, None], (B, C, S, D))
    ccn_b = jnp.broadcast_to(cc_norm[:, :, None, :], (B, C, S, D))
    pin = jnp.concatenate([ctx_b, ccn_b], axis=-1)                       # (B,C,S,2D)

    h = jnp.maximum(pin @ W1.T + b1, 0.0)
    h = jnp.maximum(h @ W2.T + b2, 0.0)
    pw = jax.nn.sigmoid(h @ W3.T + b3)                                   # (B,C,S,D)
    return (pw * cc[:, :, None, :]).sum(axis=1)                          # (B, S, D)


# ---------------------------------------------------------------------------
if __name__ == "__main__":
    C, D, S = 10, 64, 8          # num_cluster / slot_dim (module defaults), num_slots

    key = jax.random.PRNGKey(0)
    kx, kp, kg, kb, kx2 = jax.random.split(key, 5)
    params = init_params(kp, D)
    # perturb LayerNorm affine params so that code path is actually exercised
    params["norm"] = (1.0 + 0.1 * jax.random.normal(kg, (D,), jnp.float32),
                      0.1 * jax.random.normal(kb, (D,), jnp.float32))

    # ---- small batch (B=2): single full-block grid step --------------------
    B = 2
    x = jax.random.normal(kx, (B, C, D), jnp.float32)
    with jax.default_matmul_precision("highest"):
        ref = forward_ref(x, params, S)
    ref = jax.block_until_ready(ref)

    # default bf16 MXU path (recommended on v5e / v6e / v7x)
    out = jax.block_until_ready(slot_init_pseudo_weights(x, params, S))
    assert out.shape == (B, S, D)
    np.testing.assert_allclose(np.asarray(out), np.asarray(ref),
                               rtol=1e-1, atol=1e-1)

    # f32 MXU path (tightest accuracy)
    out_f32 = jax.block_until_ready(
        slot_init_pseudo_weights(x, params, S, mm_dtype=jnp.float32))
    np.testing.assert_allclose(np.asarray(out_f32), np.asarray(ref),
                               rtol=3e-2, atol=3e-2)

    # ---- larger batch (B=16): multi-step 'parallel' grid (TB=8, 2 steps) ---
    B2 = 16
    x2 = jax.random.normal(kx2, (B2, C, D), jnp.float32)
    with jax.default_matmul_precision("highest"):
        ref2 = forward_ref(x2, params, S)
    ref2 = jax.block_until_ready(ref2)
    out2 = jax.block_until_ready(slot_init_pseudo_weights(x2, params, S))
    assert out2.shape == (B2, S, D)
    np.testing.assert_allclose(np.asarray(out2), np.asarray(ref2),
                               rtol=1e-1, atol=1e-1)

    print("KERNEL_OK")
</pallas_src>

<mosaic_0001>
module attributes {stable_mosaic.version = 11 : i64} {
  func.func @kernel(%arg0: i32, %arg1: memref<20x64xf32, #tpu.memory_space<vmem>>, %arg2: memref<8x128xf32, #tpu.memory_space<vmem>>, %arg3: memref<64x128xbf16, #tpu.memory_space<vmem>>, %arg4: memref<128x128xbf16, #tpu.memory_space<vmem>>, %arg5: memref<128x64xbf16, #tpu.memory_space<vmem>>, %arg6: memref<8x128xf32, #tpu.memory_space<vmem>>, %arg7: memref<2x512xf32, #tpu.memory_space<vmem>>) attributes {dimension_semantics = [#tpu.dimension_semantics<parallel>], iteration_bounds = array<i64: 1>, scalar_prefetch = 0 : i64, scratch_operands = 0 : i64, tpu.core_type = #tpu.core_type<tc>, window_params = [{transform_indices = @transform_0, window_bounds = array<i64: 20, 64>}, {pipeline_mode = #tpu.pipeline_mode<synchronous>, transform_indices = @transform_1, window_bounds = array<i64: 8, 128>}, {pipeline_mode = #tpu.pipeline_mode<synchronous>, transform_indices = @transform_2, window_bounds = array<i64: 64, 128>}, {pipeline_mode = #tpu.pipeline_mode<synchronous>, transform_indices = @transform_3, window_bounds = array<i64: 128, 128>}, {pipeline_mode = #tpu.pipeline_mode<synchronous>, transform_indices = @transform_4, window_bounds = array<i64: 128, 64>}, {pipeline_mode = #tpu.pipeline_mode<synchronous>, transform_indices = @transform_5, window_bounds = array<i64: 8, 128>}, {transform_indices = @transform_6, window_bounds = array<i64: 2, 512>}]} {
    %c0 = arith.constant 0 : index
    %c0_0 = arith.constant 0 : index
    %0 = vector.load %arg3[%c0, %c0_0] : memref<64x128xbf16, #tpu.memory_space<vmem>>, vector<64x128xbf16>
    %c0_1 = arith.constant 0 : index
    %c0_2 = arith.constant 0 : index
    %1 = vector.load %arg4[%c0_1, %c0_2] : memref<128x128xbf16, #tpu.memory_space<vmem>>, vector<128x128xbf16>
    %c0_3 = arith.constant 0 : index
    %c0_4 = arith.constant 0 : index
    %2 = vector.load %arg5[%c0_3, %c0_4] : memref<128x64xbf16, #tpu.memory_space<vmem>>, vector<128x64xbf16>
    %c0_5 = arith.constant 0 : index
    %c0_6 = arith.constant 0 : index
    %3 = vector.load %arg2[%c0_5, %c0_6] : memref<8x128xf32, #tpu.memory_space<vmem>>, vector<8x128xf32>
    %c0_7 = arith.constant 0 : index
    %c0_8 = arith.constant 0 : index
    %4 = vector.load %arg6[%c0_7, %c0_8] : memref<8x128xf32, #tpu.memory_space<vmem>>, vector<8x128xf32>
    %5 = vector.extract_strided_slice %4 {offsets = [0, 0], sizes = [1, 64], strides = [1, 1]} : vector<8x128xf32> to vector<1x64xf32>
    %6 = vector.extract_strided_slice %4 {offsets = [1, 0], sizes = [1, 64], strides = [1, 1]} : vector<8x128xf32> to vector<1x64xf32>
    %7 = vector.extract_strided_slice %4 {offsets = [2, 0], sizes = [1, 128], strides = [1, 1]} : vector<8x128xf32> to vector<1x128xf32>
    %8 = vector.extract_strided_slice %4 {offsets = [3, 0], sizes = [1, 128], strides = [1, 1]} : vector<8x128xf32> to vector<1x128xf32>
    %9 = vector.extract_strided_slice %4 {offsets = [4, 0], sizes = [1, 64], strides = [1, 1]} : vector<8x128xf32> to vector<1x64xf32>
    %c0_9 = arith.constant 0 : index
    %c0_10 = arith.constant 0 : index
    %10 = vector.load %arg1[%c0_9, %c0_10] : memref<20x64xf32, #tpu.memory_space<vmem>>, vector<20x64xf32>
    %cst = arith.constant dense<0.000000e+00> : vector<20xf32>
    %11 = vector.multi_reduction <add>, %10, %cst [1] : vector<20x64xf32> to vector<20xf32>
    %12 = vector.shape_cast %11 : vector<20xf32> to vector<20x1xf32>
    %cst_11 = arith.constant 6.400000e+01 : f32
    %13 = vector.broadcast %cst_11 : f32 to vector<20x1xf32>
    %14 = arith.divf %12, %13 : vector<20x1xf32>
    %15 = vector.broadcast %14 : vector<20x1xf32> to vector<20x64xf32>
    %16 = arith.subf %10, %15 : vector<20x64xf32>
    %17 = arith.mulf %16, %16 : vector<20x64xf32>
    %cst_12 = arith.constant dense<0.000000e+00> : vector<20xf32>
    %18 = vector.multi_reduction <add>, %17, %cst_12 [1] : vector<20x64xf32> to vector<20xf32>
    %19 = vector.shape_cast %18 : vector<20xf32> to vector<20x1xf32>
    %cst_13 = arith.constant 6.400000e+01 : f32
    %20 = vector.broadcast %cst_13 : f32 to vector<20x1xf32>
    %21 = arith.divf %19, %20 : vector<20x1xf32>
    %cst_14 = arith.constant 9.99999974E-6 : f32
    %22 = vector.broadcast %cst_14 : f32 to vector<20x1xf32>
    %23 = arith.addf %21, %22 : vector<20x1xf32>
    %24 = math.rsqrt %23 : vector<20x1xf32>
    %25 = vector.broadcast %24 : vector<20x1xf32> to vector<20x64xf32>
    %26 = arith.mulf %16, %25 : vector<20x64xf32>
    %27 = vector.broadcast %5 : vector<1x64xf32> to vector<20x64xf32>
    %28 = arith.mulf %26, %27 : vector<20x64xf32>
    %29 = vector.broadcast %6 : vector<1x64xf32> to vector<20x64xf32>
    %30 = arith.addf %28, %29 : vector<20x64xf32>
    %31 = arith.truncf %30 : vector<20x64xf32> to vector<20x64xbf16>
    %cst_15 = arith.constant dense<0.000000e+00> : vector<20x128xf32>
    %32 = tpu.matmul %31, %0, %cst_15 {dimension_numbers = #tpu.dot_dimension_numbers<[1], [0], [0], [1], [0, 0, 1, 1], [], []>} : vector<20x64xbf16>, vector<64x128xbf16>, vector<20x128xf32> -> vector<20x128xf32>
    %33 = vector.broadcast %7 : vector<1x128xf32> to vector<20x128xf32>
    %34 = arith.addf %32, %33 : vector<20x128xf32>
    %35 = vector.shape_cast %34 : vector<20x128xf32> to vector<20x1x128xf32>
    %36 = vector.shape_cast %3 : vector<8x128xf32> to vector<1x8x128xf32>
    %37 = vector.broadcast %35 : vector<20x1x128xf32> to vector<20x8x128xf32>
    %38 = vector.broadcast %36 : vector<1x8x128xf32> to vector<20x8x128xf32>
    %39 = arith.addf %37, %38 : vector<20x8x128xf32>
    %cst_16 = arith.constant 0.000000e+00 : f32
    %40 = vector.broadcast %cst_16 : f32 to vector<20x8x128xf32>
    %41 = arith.maximumf %39, %40 : vector<20x8x128xf32>
    %42 = vector.shape_cast %41 : vector<20x8x128xf32> to vector<160x128xf32>
    %43 = arith.truncf %42 : vector<160x128xf32> to vector<160x128xbf16>
    %cst_17 = arith.constant dense<0.000000e+00> : vector<160x128xf32>
    %44 = tpu.matmul %43, %1, %cst_17 {dimension_numbers = #tpu.dot_dimension_numbers<[1], [0], [0], [1], [0, 0, 1, 1], [], []>} : vector<160x128xbf16>, vector<128x128xbf16>, vector<160x128xf32> -> vector<160x128xf32>
    %45 = vector.broadcast %8 : vector<1x128xf32> to vector<160x128xf32>
    %46 = arith.addf %44, %45 : vector<160x128xf32>
    %cst_18 = arith.constant 0.000000e+00 : f32
    %47 = vector.broadcast %cst_18 : f32 to vector<160x128xf32>
    %48 = arith.maximumf %46, %47 : vector<160x128xf32>
    %49 = arith.truncf %48 : vector<160x128xf32> to vector<160x128xbf16>
    %cst_19 = arith.constant dense<0.000000e+00> : vector<160x64xf32>
    %50 = tpu.matmul %49, %2, %cst_19 {dimension_numbers = #tpu.dot_dimension_numbers<[1], [0], [0], [1], [0, 0, 1, 1], [], []>} : vector<160x128xbf16>, vector<128x64xbf16>, vector<160x64xf32> -> vector<160x64xf32>
    %51 = vector.broadcast %9 : vector<1x64xf32> to vector<160x64xf32>
    %52 = arith.addf %50, %51 : vector<160x64xf32>
    %cst_20 = arith.constant 0.000000e+00 : f32
    %53 = vector.broadcast %cst_20 : f32 to vector<160x64xf32>
    %54 = arith.subf %53, %52 : vector<160x64xf32>
    %55 = math.exp %54 : vector<160x64xf32>
    %cst_21 = arith.constant 1.000000e+00 : f32
    %56 = vector.broadcast %cst_21 : f32 to vector<160x64xf32>
    %57 = arith.addf %56, %55 : vector<160x64xf32>
    %58 = tpu.reciprocal %57 {approx = true} : vector<160x64xf32> -> vector<160x64xf32>
    %59 = vector.shape_cast %58 : vector<160x64xf32> to vector<20x8x64xf32>
    %60 = vector.shape_cast %10 : vector<20x64xf32> to vector<20x1x64xf32>
    %61 = vector.broadcast %60 : vector<20x1x64xf32> to vector<20x8x64xf32>
    %62 = arith.mulf %59, %61 : vector<20x8x64xf32>
    %63 = vector.shape_cast %62 : vector<20x8x64xf32> to vector<2x80x64xf32>
    %64 = vector.extract_strided_slice %63 {offsets = [0, 0, 0], sizes = [2, 8, 64], strides = [1, 1, 1]} : vector<2x80x64xf32> to vector<2x8x64xf32>
    %65 = vector.extract_strided_slice %63 {offsets = [0, 8, 0], sizes = [2, 8, 64], strides = [1, 1, 1]} : vector<2x80x64xf32> to vector<2x8x64xf32>
    %66 = arith.addf %64, %65 : vector<2x8x64xf32>
    %67 = vector.extract_strided_slice %63 {offsets = [0, 16, 0], sizes = [2, 8, 64], strides = [1, 1, 1]} : vector<2x80x64xf32> to vector<2x8x64xf32>
    %68 = arith.addf %66, %67 : vector<2x8x64xf32>
    %69 = vector.extract_strided_slice %63 {offsets = [0, 24, 0], sizes = [2, 8, 64], strides = [1, 1, 1]} : vector<2x80x64xf32> to vector<2x8x64xf32>
    %70 = arith.addf %68, %69 : vector<2x8x64xf32>
    %71 = vector.extract_strided_slice %63 {offsets = [0, 32, 0], sizes = [2, 8, 64], strides = [1, 1, 1]} : vector<2x80x64xf32> to vector<2x8x64xf32>
    %72 = arith.addf %70, %71 : vector<2x8x64xf32>
    %73 = vector.extract_strided_slice %63 {offsets = [0, 40, 0], sizes = [2, 8, 64], strides = [1, 1, 1]} : vector<2x80x64xf32> to vector<2x8x64xf32>
    %74 = arith.addf %72, %73 : vector<2x8x64xf32>
    %75 = vector.extract_strided_slice %63 {offsets = [0, 48, 0], sizes = [2, 8, 64], strides = [1, 1, 1]} : vector<2x80x64xf32> to vector<2x8x64xf32>
    %76 = arith.addf %74, %75 : vector<2x8x64xf32>
    %77 = vector.extract_strided_slice %63 {offsets = [0, 56, 0], sizes = [2, 8, 64], strides = [1, 1, 1]} : vector<2x80x64xf32> to vector<2x8x64xf32>
    %78 = arith.addf %76, %77 : vector<2x8x64xf32>
    %79 = vector.extract_strided_slice %63 {offsets = [0, 64, 0], sizes = [2, 8, 64], strides = [1, 1, 1]} : vector<2x80x64xf32> to vector<2x8x64xf32>
    %80 = arith.addf %78, %79 : vector<2x8x64xf32>
    %81 = vector.extract_strided_slice %63 {offsets = [0, 72, 0], sizes = [2, 8, 64], strides = [1, 1, 1]} : vector<2x80x64xf32> to vector<2x8x64xf32>
    %82 = arith.addf %80, %81 : vector<2x8x64xf32>
    %83 = vector.extract_strided_slice %82 {offsets = [0, 0, 0], sizes = [2, 1, 64], strides = [1, 1, 1]} : vector<2x8x64xf32> to vector<2x1x64xf32>
    %84 = vector.shape_cast %83 : vector<2x1x64xf32> to vector<2x64xf32>
    %85 = vector.extract_strided_slice %82 {offsets = [0, 1, 0], sizes = [2, 1, 64], strides = [1, 1, 1]} : vector<2x8x64xf32> to vector<2x1x64xf32>
    %86 = vector.shape_cast %85 : vector<2x1x64xf32> to vector<2x64xf32>
    %87 = vector.extract_strided_slice %82 {offsets = [0, 2, 0], sizes = [2, 1, 64], strides = [1, 1, 1]} : vector<2x8x64xf32> to vector<2x1x64xf32>
    %88 = vector.shape_cast %87 : vector<2x1x64xf32> to vector<2x64xf32>
    %89 = vector.extract_strided_slice %82 {offsets = [0, 3, 0], sizes = [2, 1, 64], strides = [1, 1, 1]} : vector<2x8x64xf32> to vector<2x1x64xf32>
    %90 = vector.shape_cast %89 : vector<2x1x64xf32> to vector<2x64xf32>
    %91 = vector.extract_strided_slice %82 {offsets = [0, 4, 0], sizes = [2, 1, 64], strides = [1, 1, 1]} : vector<2x8x64xf32> to vector<2x1x64xf32>
    %92 = vector.shape_cast %91 : vector<2x1x64xf32> to vector<2x64xf32>
    %93 = vector.extract_strided_slice %82 {offsets = [0, 5, 0], sizes = [2, 1, 64], strides = [1, 1, 1]} : vector<2x8x64xf32> to vector<2x1x64xf32>
    %94 = vector.shape_cast %93 : vector<2x1x64xf32> to vector<2x64xf32>
    %95 = vector.extract_strided_slice %82 {offsets = [0, 6, 0], sizes = [2, 1, 64], strides = [1, 1, 1]} : vector<2x8x64xf32> to vector<2x1x64xf32>
    %96 = vector.shape_cast %95 : vector<2x1x64xf32> to vector<2x64xf32>
    %97 = vector.extract_strided_slice %82 {offsets = [0, 7, 0], sizes = [2, 1, 64], strides = [1, 1, 1]} : vector<2x8x64xf32> to vector<2x1x64xf32>
    %98 = vector.shape_cast %97 : vector<2x1x64xf32> to vector<2x64xf32>
    %99 = tpu.concatenate %84, %86, %88, %90, %92, %94, %96, %98 in 1 : vector<2x64xf32>, vector<2x64xf32>, vector<2x64xf32>, vector<2x64xf32>, vector<2x64xf32>, vector<2x64xf32>, vector<2x64xf32>, vector<2x64xf32> -> vector<2x512xf32>
    %c0_22 = arith.constant 0 : index
    %c0_23 = arith.constant 0 : index
    %100 = vector.load %arg7[%c0_22, %c0_23] : memref<2x512xf32, #tpu.memory_space<vmem>>, vector<2x512xf32>
    tpu.vector_store %arg7[%c0_22, %c0_23], %99 {strides = array<i32>} : memref<2x512xf32, #tpu.memory_space<vmem>>, vector<2x512xf32>,
    return
  }
  func.func @transform_0(%arg0: i32) -> (i32, i32) {
    %c0_i32 = arith.constant 0 : i32
    %c0_i32_0 = arith.constant 0 : i32
    return %arg0, %c0_i32 : i32, i32
  }
  func.func @transform_1(%arg0: i32) -> (i32, i32) {
    %c0_i32 = arith.constant 0 : i32
    %c0_i32_0 = arith.constant 0 : i32
    %c0_i32_1 = arith.constant 0 : i32
    return %c0_i32, %c0_i32_0 : i32, i32
  }
  func.func @transform_2(%arg0: i32) -> (i32, i32) {
    %c0_i32 = arith.constant 0 : i32
    %c0_i32_0 = arith.constant 0 : i32
    %c0_i32_1 = arith.constant 0 : i32
    return %c0_i32, %c0_i32_0 : i32, i32
  }
  func.func @transform_3(%arg0: i32) -> (i32, i32) {
    %c0_i32 = arith.constant 0 : i32
    %c0_i32_0 = arith.constant 0 : i32
    %c0_i32_1 = arith.constant 0 : i32
    return %c0_i32, %c0_i32_0 : i32, i32
  }
  func.func @transform_4(%arg0: i32) -> (i32, i32) {
    %c0_i32 = arith.constant 0 : i32
    %c0_i32_0 = arith.constant 0 : i32
    %c0_i32_1 = arith.constant 0 : i32
    return %c0_i32, %c0_i32_0 : i32, i32
  }
  func.func @transform_5(%arg0: i32) -> (i32, i32) {
    %c0_i32 = arith.constant 0 : i32
    %c0_i32_0 = arith.constant 0 : i32
    %c0_i32_1 = arith.constant 0 : i32
    return %c0_i32, %c0_i32_0 : i32, i32
  }
  func.func @transform_6(%arg0: i32) -> (i32, i32) {
    %c0_i32 = arith.constant 0 : i32
    %c0_i32_0 = arith.constant 0 : i32
    return %arg0, %c0_i32 : i32, i32
  }
}

</mosaic_0001>

<bundles_post_ra>
// kernel: tpu_custom_call.1
= control target key start
LH: loop header
LB: loop body
LE: loop exit
PB: predicated region body
PF: predicated region fallthrough
CT: control target
= control target key end

     0   :  { %11 = vsyncpa [#allocation3], 0  ;;  %s1456_s0 = inlined_call_operand.hbm [shape: f32[20,64], index: 0, kind: input, shape index: {}]   ;;  %s1457_s1 = inlined_call_operand.hbm [shape: f32[8,128], index: 1, kind: input, shape index: {}]   ;;  %s1458_s2 = inlined_call_operand.vmem [shape: bf16[64,128], index: 2, kind: input, shape index: {}]   ;;  %s1459_s3 = inlined_call_operand.vmem [shape: bf16[128,128], index: 3, kind: input, shape index: {}]   ;;  %s1460_s4 = inlined_call_operand.vmem [shape: bf16[128,64], index: 4, kind: input, shape index: {}]   ;;  %s1461_s5 = inlined_call_operand.hbm [shape: f32[8,128], index: 5, kind: input, shape index: {}]   ;;  %s1462_s6 = inlined_call_operand.hbm [shape: f32[2,512], index: 6, kind: output, shape index: {}]  }
   0x1   :  { %12 = vsyncpa [#allocation6], 0  ;;  %s32_s23 = sshll.u32 %s1457_s1, 4  ;;  %s33_s23 = int_to_ptr.hbm [resolvable:$true] %s32_s23 }
   0x2   :  { %13 = vsyncpa [#allocation4], 0  ;;  %s1197_s24 = smov [#allocation5]   ;;  %s18_s28 = sshll.u32 %s1456_s0, 4  ;;  %s19_s28 = int_to_ptr.hbm [resolvable:$true] %s18_s28 }
   0x3   :  { %s34_s25 = sshll.u32 %s1197_s24, 4  ;;  %s1198_s29 = smov [#allocation2]   ;;  %s35_s25 = int_to_ptr.vmem [resolvable:$true] %s34_s25 }
   0x4   :  { %37 = dma.hbm_to_vmem [thread:$0]  %s33_s23, 128, %s35_s25, [#allocation6]  }
   0x5   :  { %s20_s30 = sshll.u32 %s1198_s29, 4  ;;  %s1199_s7 = smov 128   ;;  %s21_s30 = int_to_ptr.vmem [resolvable:$true] %s20_s30 }
   0x6   :  { %s1200_s8 = smov 8   ;;  %s49_s1 = sshll.u32 %s1461_s5, 4  ;;  %s50_s1 = int_to_ptr.hbm [resolvable:$true] %s49_s1 }
   0x7   :  { %26 = dma.hbm_to_vmem [thread:$0]  %s19_s28, 384, %s21_s30, [#allocation3], %s1199_s7, %s1199_s7, %s1200_s8  }
   0x8   :  { %s1201_s11 = smov [#allocation7]  }
   0x9   :  { %s51_s12 = sshll.u32 %s1201_s11, 4  ;;  %s52_s12 = int_to_ptr.vmem [resolvable:$true] %s51_s12 }
   0xa   :  { %54 = dma.hbm_to_vmem [thread:$0]  %s50_s1, 128, %s52_s12, [#allocation6]  }
   0xb   :  { %1191 = dma.done.wait [#allocation3], 384  }
   0xc   :  { %1192 = vsyncadd [#allocation3], 4294966912 }
   0xd   :  { %1193 = dma.done.wait [#allocation6], 256  }
   0xe   :  { %1194 = vsyncadd [#allocation6], 4294967040  ;;  %vm120_vm0 = vcmask 519168   ;;  %vm113_vm1 = vcmask 523264   ;;  %v112_v0 = vld [vmem:[#allocation2 + $0x10] sm:$0xf] }
   0xf   :  { %v1249_v1 = vld [vmem:[#allocation2] sm:$0xff]  ;;  %v121_v2 = vsel %vm120_vm0, %v112_v0, 0.0  ;;  %v1254_v4 = vld [vmem:[#allocation2 + $0x8] sm:$0xff]  ;;  %v1202_v6 = vmov 64.0   ;;  %v964_v28 = vld [vmem:[%s1458_s2 + $0x18] sm:$0xff]  ;;  %vm804_vm12 = vcmask 1041409  }
  0x10   :  { %v114_v3 = vsel %vm113_vm1, %v1249_v1, 0.0  ;;  %122 = vadd.xlane.f32.xlu2 %v121_v2  ;;  %v117_v5 = vsel %vm113_vm1, %v1254_v4, 0.0  ;;  %1005 = vrcp.f32 %v1202_v6  ;;  %233 = vmatpush.bf16.msra.mxu0 %v964_v28  ;;  %v963_v29 = vld [vmem:[%s1458_s2 + $0x10] sm:$0xff]  ;;  %v962_v30 = vld [vmem:[%s1458_s2 + $0x8] sm:$0xff]  ;;  %v961_v35 = vld [vmem:[%s1458_s2] sm:$0xff]  ;;  %vm855_vm13 = vcmask 1045508  }
  0x11   :  { %115 = vadd.xlane.f32.xlu0 %v114_v3  ;;  %v972_v53 = vld [vmem:[%s1459_s3 + $0x38] sm:$0xff]  ;;  %v1282_v56 = vld [vmem:[#allocation7] sm:$0xff]  ;;  %v971_v57 = vld [vmem:[%s1459_s3 + $0x30] sm:$0xff]  ;;  %vm853_vm14 = vcmask 1041408   ;;  %s1204_s21 = smov [#allocation8]   ;;  %s868_s25 = sshll.u32 %s1462_s6, 4  ;;  %s869_s25 = int_to_ptr.hbm [resolvable:$true] %s868_s25 }
  0x12   :  { %406 = vmatpush.bf16.msra.mxu1 %v972_v53  ;;  %981 = vmatpush.bf16.msra.mxu3 %v972_v53  ;;  %v188_v61 = vperm.slane %v1282_v56, 0  ;;  %v970_v63 = vld [vmem:[%s1459_s3 + $0x28] sm:$0xff]  ;;  %v192_v6 = vperm.slane %v1282_v56, 1  ;;  %s866_s22 = sshll.u32 %s1204_s21, 4  ;;  %vm857_vm15 = vcmask 1043456   ;;  %s867_s22 = int_to_ptr.vmem [resolvable:$true] %s866_s22 }
  0x14   :  { %234 = vmatpush.bf16.msra.mxu0 %v963_v29 }
  0x16   :  { %v1006_v7 = vpop.eup %1005  ;;  %407 = vmatpush.bf16.msra.mxu1 %v971_v57  ;;  %982 = vmatpush.bf16.msra.mxu3 %v971_v57 }
  0x17   :  { %v125_v8 = vmul.f32 64.0, %v1006_v7  ;;  %vm129_vm2 = vweird.f32 %v1006_v7 }
  0x18   :  { %235 = vmatpush.bf16.msra.mxu0 %v962_v30 }
  0x19   :  { %118 = vadd.xlane.f32.xlu0 %v117_v5  ;;  %v126_v9 = vsub.f32 1.0, %v125_v8  ;;  %v969_v8 = vld [vmem:[%s1459_s3 + $0x20] sm:$0xff] }
  0x1a   :  { %408 = vmatpush.bf16.msra.mxu1 %v970_v63  ;;  %983 = vmatpush.bf16.msra.mxu3 %v970_v63 }
  0x1b   :  { %v127_v10 = vmul.f32 %v1006_v7, %v126_v9 }
  0x1c   :  { %236 = vmatpush.bf16.msra.mxu0 %v961_v35 }
  0x1d   :  { %v128_v11 = vadd.f32 %v1006_v7, %v127_v10 }
  0x1e   :  { %409 = vmatpush.bf16.msra.mxu1 %v969_v8  ;;  %984 = vmatpush.bf16.msra.mxu3 %v969_v8 }
  0x1f   :  { %v130_v12 = vsel %vm129_vm2, %v1006_v7, %v128_v11 }
  0x83   :  { %v123_v13 = vpop.xlane.xlu2 %122 }
  0x84   :  { %v116_v14 = vpop.xlane.xlu0 %115  ;;  %v133_v15 = vmul.f32 %v130_v12, %v123_v13  ;;  %v968_v13 = vld [vmem:[%s1459_s3 + $0x18] sm:$0xff] }
  0x85   :  { %v131_v16 = vmul.f32 %v130_v12, %v116_v14  ;;  %410 = vmatpush.bf16.msra.mxu1 %v968_v13  ;;  %985 = vmatpush.bf16.msra.mxu3 %v968_v13 }
  0x86   :  { %v1258_v17 = vsub.f32 %v112_v0, %v133_v15 }
  0x87   :  { %v134_v18 = vsub.f32 %v1249_v1, %v131_v16 }
  0x88   :  { %v139_v19 = vmul.f32 %v1258_v17, %v1258_v17 }
  0x89   :  { %v137_v20 = vmul.f32 %v134_v18, %v134_v18 }
  0x8a   :  { %v146_v21 = vsel %vm120_vm0, %v139_v19, 0.0 }
  0x8b   :  { %v140_v22 = vsel %vm113_vm1, %v137_v20, 0.0  ;;  %147 = vadd.xlane.f32.xlu2 %v146_v21  ;;  %v967_v20 = vld [vmem:[%s1459_s3 + $0x10] sm:$0xff]  ;;  %v966_v21 = vld [vmem:[%s1459_s3 + $0x8] sm:$0xff] }
  0x8c   :  { %141 = vadd.xlane.f32.xlu1 %v140_v22  ;;  %v119_v23 = vpop.xlane.xlu0 %118  ;;  %411 = vmatpush.bf16.msra.mxu1 %v967_v20  ;;  %v1311_v22 = vperm.slane %v1282_v56, 2 }
  0x8d   :  { %v132_v24 = vmul.f32 %v130_v12, %v119_v23  ;;  %986 = vmatpush.bf16.msra.mxu3 %v967_v20 }
  0x8f   :  { %v135_v25 = vsub.f32 %v1254_v4, %v132_v24 }
  0x90   :  { %412 = vmatpush.bf16.msra.mxu1 %v966_v21 }
  0x91   :  { %v138_v26 = vmul.f32 %v135_v25, %v135_v25  ;;  %987 = vmatpush.bf16.msra.mxu3 %v966_v21 }
  0x93   :  { %v143_v27 = vsel %vm113_vm1, %v138_v26, 0.0 }
  0x94   :  { %144 = vadd.xlane.f32.xlu1 %v143_v27 }
  0xfe   :  { %v148_v31 = vpop.xlane.xlu2 %147 }
  0xff   :  { %v142_v32 = vpop.xlane.xlu1 %141  ;;  %v151_v33 = vmul.f32 %v148_v31, %v130_v12 }
 0x100   :  { %v149_v34 = vmul.f32 %v142_v32, %v130_v12 }
 0x101   :  { %v154_v37 = vadd.f32 1e-05, %v151_v33 }
 0x102   :  { %v152_v36 = vadd.f32 1e-05, %v149_v34 }
 0x103   :  { %vm181_vm9 = vweird.f32 %v154_v37 }
 0x104   :  { %1007 = vrsqrt.f32 %v152_v36  ;;  %vm161_vm4 = vweird.f32 %v152_v36 }
 0x105   :  { %1009 = vrsqrt.f32 %v154_v37 }
 0x107   :  { %v145_v38 = vpop.xlane.xlu1 %144 }
 0x108   :  { %v150_v39 = vmul.f32 %v145_v38, %v130_v12 }
 0x10a   :  { %v153_v40 = vadd.f32 1e-05, %v150_v39  ;;  %v1008_v41 = vpop.eup %1007 }
 0x10b   :  { %v156_v42 = vmul.f32 %v1008_v41, %v152_v36  ;;  %v1010_v43 = vpop.eup %1009  ;;  %vm162_vm3 = vweird.f32 %v1008_v41 }
 0x10c   :  { %1011 = vrsqrt.f32 %v153_v40  ;;  %v176_v46 = vmul.f32 %v1010_v43, %v154_v37  ;;  %vm163_vm5 = vmor %vm161_vm4, %vm162_vm3  ;;  %vm171_vm7 = vweird.f32 %v153_v40  ;;  %vm182_vm10 = vweird.f32 %v1010_v43 }
 0x10d   :  { %v157_v44 = vmul.f32 %v1008_v41, %v156_v42  ;;  %vm183_vm11 = vmor %vm181_vm9, %vm182_vm10 }
 0x10e   :  { %v177_v51 = vmul.f32 %v1010_v43, %v176_v46 }
 0x10f   :  { %v158_v45 = vmul.f32 0.5, %v157_v44 }
 0x110   :  { %v178_v58 = vmul.f32 0.5, %v177_v51 }
 0x111   :  { %v159_v48 = vsub.f32 1.5, %v158_v45 }
 0x112   :  { %v1012_v47 = vpop.eup %1011  ;;  %v179_v0 = vsub.f32 1.5, %v178_v58 }
 0x113   :  { %v166_v49 = vmul.f32 %v1012_v47, %v153_v40  ;;  %v160_v50 = vmul.f32 %v1008_v41, %v159_v48  ;;  %vm172_vm6 = vweird.f32 %v1012_v47 }
 0x114   :  { %vm173_vm8 = vmor %vm171_vm7, %vm172_vm6  ;;  %v180_v9 = vmul.f32 %v1010_v43, %v179_v0 }
 0x115   :  { %v167_v52 = vmul.f32 %v1012_v47, %v166_v49  ;;  %v164_v54 = vsel %vm163_vm5, %v1008_v41, %v160_v50 }
 0x116   :  { %v185_v60 = vmul.f32 %v164_v54, %v134_v18  ;;  %v184_v14 = vsel %vm183_vm11, %v1010_v43, %v180_v9 }
 0x117   :  { %v168_v55 = vmul.f32 0.5, %v167_v52  ;;  %v187_v15 = vmul.f32 %v184_v14, %v1258_v17  ;;  %v965_v17 = vld [vmem:[%s1459_s3] sm:$0xff] }
 0x118   :  { %v189_v5 = vmul.f32 %v188_v61, %v185_v60  ;;  %413 = vmatpush.bf16.msra.mxu1 %v965_v17  ;;  %988 = vmatpush.bf16.msra.mxu3 %v965_v17 }
 0x119   :  { %v169_v59 = vsub.f32 1.5, %v168_v55  ;;  %v191_v16 = vmul.f32 %v188_v61, %v187_v15 }
 0x11a   :  { %v193_v10 = vadd.f32 %v192_v6, %v189_v5 }
 0x11b   :  { %v170_v62 = vmul.f32 %v1012_v47, %v169_v59  ;;  %v195_v18 = vadd.f32 %v192_v6, %v191_v16 }
 0x11d   :  { %v174_v2 = vsel %vm173_vm8, %v1012_v47, %v170_v62  ;;  %v197_v19 = vpack.c.bf16 %v195_v18, %v195_v18 }
 0x11e   :  { %v186_v3 = vmul.f32 %v174_v2, %v135_v25  ;;  %v1316_v25 = vld [vmem:[#allocation5] sm:$0xff] }
 0x120   :  { %v190_v7 = vmul.f32 %v188_v61, %v186_v3 }
 0x122   :  { %v194_v11 = vadd.f32 %v192_v6, %v190_v7 }
 0x124   :  { %v196_v12 = vpack.c.bf16 %v194_v11, %v193_v10 }
 0x126   :  { %895 = vmatmul.msk.bf16.vlgmr.msra.gmra.mxu0 %vm113_vm1, %v196_v12 }
 0x136   :  { %896 = vmatmul.msk.bf16.gmra.mxu0 %vm113_vm1, %v197_v19 }
 0x1a3   :  { %v238_v23 = vpop.f32.mrf.mxu0 }
 0x1a4   :  { %v1314_v24 = vadd.f32 %v238_v23, %v1311_v22 }
 0x1a6   :  { %v250_v26 = vrot.slane %v1314_v24, 1  ;;  %v267_v27 = vperm.slane %v1314_v24, 0  ;;  %v251_v35 = vrot.slane %v1314_v24, 2  ;;  %v252_v36 = vrot.slane %v1314_v24, 3 }
 0x1a7   :  { %v253_v15 = vrot.slane %v1314_v24, 4  ;;  %v254_v20 = vrot.slane %v1314_v24, 5 }
 0x1a8   :  { %v268_v28 = vperm.slane %v250_v26, 0  ;;  %v307_v29 = vadd.f32 %v267_v27, %v1316_v25  ;;  %v269_v44 = vperm.slane %v251_v35, 0  ;;  %v270_v45 = vperm.slane %v252_v36, 0 }
 0x1a9   :  { %v271_v21 = vperm.slane %v253_v15, 0  ;;  %v272_v27 = vperm.slane %v254_v20, 0  ;;  %v255_v36 = vrot.slane %v1314_v24, 6 }
 0x1aa   :  { %v308_v30 = vadd.f32 %v268_v28, %v1316_v25  ;;  %v327_v33 = vmax.f32 %v307_v29, 0.0  ;;  %v309_v59 = vadd.f32 %v269_v44, %v1316_v25  ;;  %v310_v62 = vadd.f32 %v270_v45, %v1316_v25 }
 0x1ab   :  { %v240_v31 = vpop.f32.mrf.mxu0  ;;  %v311_v29 = vadd.f32 %v271_v21, %v1316_v25 }
 0x1ac   :  { %v241_v32 = vadd.f32 %v240_v31, %v1311_v22  ;;  %v328_v34 = vmax.f32 %v308_v30, 0.0  ;;  %v329_v9 = vmax.f32 %v309_v59, 0.0  ;;  %v330_v10 = vmax.f32 %v310_v62, 0.0  ;;  %v979_v59 = vld [vmem:[%s1460_s4 + $0x30] sm:$0xff]  ;;  %v976_v62 = vld [vmem:[%s1460_s4 + $0x18] sm:$0xff] }
 0x1ad   :  { %v312_v30 = vadd.f32 %v272_v27, %v1316_v25 }
 0x1ae   :  { %v347_v37 = vpack.c.bf16 %v328_v34, %v327_v33  ;;  %v260_v38 = vrot.slane %v241_v32, 4  ;;  %v261_v39 = vrot.slane %v241_v32, 5  ;;  %v257_v42 = vrot.slane %v241_v32, 1 }
 0x1af   :  { %v275_v43 = vperm.slane %v241_v32, 0  ;;  %v258_v46 = vrot.slane %v241_v32, 2  ;;  %v259_v47 = vrot.slane %v241_v32, 3  ;;  %v262_v63 = vrot.slane %v241_v32, 6 }
 0x1b0   :  { %414 = vmatmul.bf16.vlgmr.msra.gmra.mxu1 %v347_v37  ;;  %v279_v40 = vperm.slane %v260_v38, 0  ;;  %v280_v41 = vperm.slane %v261_v39, 0  ;;  %v276_v50 = vperm.slane %v257_v42, 0  ;;  %v263_v0 = vrot.slane %v241_v32, 7 }
 0x1b1   :  { %v315_v51 = vadd.f32 %v275_v43, %v1316_v25  ;;  %v277_v53 = vperm.slane %v258_v46, 0  ;;  %v278_v54 = vperm.slane %v259_v47, 0  ;;  %v281_v11 = vperm.slane %v262_v63, 0  ;;  %v975_v63 = vld [vmem:[%s1460_s4 + $0x10] sm:$0xff] }
 0x1b2   :  { %v319_v48 = vadd.f32 %v279_v40, %v1316_v25  ;;  %v320_v49 = vadd.f32 %v280_v41, %v1316_v25  ;;  %v316_v58 = vadd.f32 %v276_v50, %v1316_v25  ;;  %v282_v12 = vperm.slane %v263_v0, 0  ;;  %v974_v0 = vld [vmem:[%s1460_s4 + $0x8] sm:$0xff] }
 0x1b3   :  { %v243_v52 = vpop.f32.mrf.mxu0  ;;  %v317_v60 = vadd.f32 %v277_v53, %v1316_v25  ;;  %v335_v2 = vmax.f32 %v315_v51, 0.0  ;;  %v318_v5 = vadd.f32 %v278_v54, %v1316_v25  ;;  %v348_v16 = vpack.c.bf16 %v330_v10, %v329_v9 }
 0x1b4   :  { %v339_v55 = vmax.f32 %v319_v48, 0.0  ;;  %v340_v57 = vmax.f32 %v320_v49, 0.0  ;;  %v336_v3 = vmax.f32 %v316_v58, 0.0  ;;  %v321_v18 = vadd.f32 %v281_v11, %v1316_v25 }
 0x1b5   :  { %v337_v6 = vmax.f32 %v317_v60, 0.0  ;;  %v338_v8 = vmax.f32 %v318_v5, 0.0  ;;  %v322_v19 = vadd.f32 %v282_v12, %v1316_v25  ;;  %v244_v17 = vadd.f32 %v243_v52, %v1311_v22 }
 0x1b6   :  { %v353_v61 = vpack.c.bf16 %v340_v57, %v339_v55  ;;  %v1333_v7 = vpack.c.bf16 %v336_v3, %v335_v2  ;;  %v341_v23 = vmax.f32 %v321_v18, 0.0  ;;  %v331_v32 = vmax.f32 %v311_v29, 0.0  ;;  %v980_v55 = vld [vmem:[%s1460_s4 + $0x38] sm:$0xff]  ;;  %v973_v2 = vld [vmem:[%s1460_s4] sm:$0xff] }
 0x1b7   :  { %v352_v14 = vpack.c.bf16 %v338_v8, %v337_v6  ;;  %v342_v26 = vmax.f32 %v322_v19, 0.0  ;;  %v264_v31 = vrot.slane %v244_v17, 1  ;;  %v332_v33 = vmax.f32 %v312_v30, 0.0  ;;  %544 = vmatpush.bf16.msrb.mxu0 %v980_v55  ;;  %989 = vmatpush.bf16.msra.mxu2 %v980_v55 }
 0x1b8   :  { %444 = vmatmul.bf16.vlgmr.msra.gmra.mxu3 %v353_v61  ;;  %v283_v35 = vperm.slane %v244_v17, 0  ;;  %v256_v22 = vrot.slane %v1314_v24, 7  ;;  %v273_v40 = vperm.slane %v255_v36, 0  ;;  %v265_v47 = vrot.slane %v244_v17, 2  ;;  %v978_v61 = vld [vmem:[%s1460_s4 + $0x28] sm:$0xff] }
 0x1b9   :  { %v354_v28 = vpack.c.bf16 %v342_v26, %v341_v23  ;;  %v284_v34 = vperm.slane %v264_v31, 0  ;;  %v349_v37 = vpack.c.bf16 %v332_v33, %v331_v32  ;;  %v266_v48 = vrot.slane %v244_v17, 3 }
 0x1ba   :  { %v323_v39 = vadd.f32 %v283_v35, %v1316_v25  ;;  %v274_v42 = vperm.slane %v256_v22, 0  ;;  %v313_v44 = vadd.f32 %v273_v40, %v1316_v25  ;;  %v285_v51 = vperm.slane %v265_v47, 0 }
 0x1bb   :  { %v245_v13 = vpop.f32.mrf.mxu0  ;;  %v324_v38 = vadd.f32 %v284_v34, %v1316_v25  ;;  %v286_v52 = vperm.slane %v266_v48, 0  ;;  %545 = vmatpush.bf16.msrb.mxu0 %v979_v59  ;;  %990 = vmatpush.bf16.msra.mxu2 %v979_v59  ;;  %v1376_v5 = vperm.slane %v1282_v56, 3 }
 0x1bc   :  { %v343_v43 = vmax.f32 %v323_v39, 0.0  ;;  %v314_v46 = vadd.f32 %v274_v42, %v1316_v25  ;;  %v333_v49 = vmax.f32 %v313_v44, 0.0  ;;  %v325_v53 = vadd.f32 %v285_v51, %v1316_v25 }
 0x1bd   :  { %v344_v41 = vmax.f32 %v324_v38, 0.0  ;;  %v326_v54 = vadd.f32 %v286_v52, %v1316_v25  ;;  %v977_v25 = vld [vmem:[%s1460_s4 + $0x20] sm:$0xff]  ;;  %s1203_s4 = smov 64  }
 0x1be   :  { %v334_v50 = vmax.f32 %v314_v46, 0.0  ;;  %v345_v57 = vmax.f32 %v325_v53, 0.0 }
 0x1bf   :  { %v355_v45 = vpack.c.bf16 %v344_v41, %v343_v43  ;;  %v346_v58 = vmax.f32 %v326_v54, 0.0  ;;  %546 = vmatpush.bf16.msrb.mxu0 %v978_v61  ;;  %991 = vmatpush.bf16.msra.mxu2 %v978_v61 }
 0x1c0   :  { %419 = vmatmul.bf16.gmra.mxu1 %v348_v16  ;;  %v350_v24 = vpack.c.bf16 %v334_v50, %v333_v49 }
 0x1c1   :  { %v356_v60 = vpack.c.bf16 %v346_v58, %v345_v57 }
 0x1c3   :  { %547 = vmatpush.bf16.msrb.mxu0 %v977_v25  ;;  %992 = vmatpush.bf16.msra.mxu2 %v977_v25 }
 0x1c7   :  { %548 = vmatpush.bf16.msrb.mxu0 %v976_v62  ;;  %993 = vmatpush.bf16.msra.mxu2 %v976_v62 }
 0x1c8   :  { %449 = vmatmul.bf16.gmra.mxu3 %v354_v28 }
 0x1cb   :  { %549 = vmatpush.bf16.msrb.mxu0 %v975_v63  ;;  %994 = vmatpush.bf16.msra.mxu2 %v975_v63 }
 0x1cf   :  { %550 = vmatpush.bf16.msrb.mxu0 %v974_v0  ;;  %995 = vmatpush.bf16.msra.mxu2 %v974_v0 }
 0x1d0   :  { %424 = vmatmul.bf16.gmra.mxu1 %v349_v37 }
 0x1d3   :  { %551 = vmatpush.bf16.msrb.mxu0 %v973_v2  ;;  %996 = vmatpush.bf16.msra.mxu2 %v973_v2 }
 0x1d8   :  { %454 = vmatmul.bf16.gmra.mxu3 %v355_v45 }
 0x1e0   :  { %429 = vmatmul.bf16.gmra.mxu1 %v350_v24 }
 0x1e8   :  { %459 = vmatmul.bf16.gmra.mxu3 %v356_v60 }
 0x1f0   :  { %434 = vmatmul.bf16.gmra.mxu1 %v1333_v7 }
 0x200   :  { %439 = vmatmul.bf16.gmra.mxu1 %v352_v14 }
 0x22d   :  { %v415_v3 = vpop.f32.mrf.mxu1 }
 0x22e   :  { %v416_v6 = vadd.f32 %v415_v3, %v1376_v5 }
 0x230   :  { %v465_v9 = vmax.f32 %v416_v6, 0.0 }
 0x235   :  { %v417_v7 = vpop.f32.mrf.mxu1 }
 0x236   :  { %v418_v8 = vadd.f32 %v417_v7, %v1376_v5 }
 0x238   :  { %v466_v10 = vmax.f32 %v418_v8, 0.0 }
 0x23a   :  { %v485_v11 = vpack.c.bf16 %v466_v10, %v465_v9 }
 0x23b   :  { %v445_v41 = vpop.f32.mrf.mxu3 }
 0x23c   :  { %552 = vmatmul.bf16.vlgmr.msrb.gmra.mxu0 %v485_v11  ;;  %v446_v24 = vadd.f32 %v445_v41, %v1376_v5 }
 0x23d   :  { %v420_v12 = vpop.f32.mrf.mxu1 }
 0x23e   :  { %v421_v13 = vadd.f32 %v420_v12, %v1376_v5  ;;  %v477_v55 = vmax.f32 %v446_v24, 0.0 }
 0x240   :  { %v467_v16 = vmax.f32 %v421_v13, 0.0 }
 0x243   :  { %v447_v44 = vpop.f32.mrf.mxu3 }
 0x244   :  { %v448_v52 = vadd.f32 %v447_v44, %v1376_v5 }
 0x245   :  { %v422_v14 = vpop.f32.mrf.mxu1 }
 0x246   :  { %v423_v15 = vadd.f32 %v422_v14, %v1376_v5  ;;  %v478_v53 = vmax.f32 %v448_v52, 0.0 }
 0x248   :  { %v468_v18 = vmax.f32 %v423_v15, 0.0  ;;  %v491_v57 = vpack.c.bf16 %v478_v53, %v477_v55 }
 0x24a   :  { %v486_v19 = vpack.c.bf16 %v468_v18, %v467_v16 }
 0x24b   :  { %v450_v51 = vpop.f32.mrf.mxu3 }
 0x24c   :  { %557 = vmatmul.bf16.gmra.mxu0 %v486_v19  ;;  %v451_v60 = vadd.f32 %v450_v51, %v1376_v5 }
 0x24d   :  { %v425_v20 = vpop.f32.mrf.mxu1 }
 0x24e   :  { %v426_v21 = vadd.f32 %v425_v20, %v1376_v5  ;;  %v479_v25 = vmax.f32 %v451_v60, 0.0 }
 0x250   :  { %v469_v26 = vmax.f32 %v426_v21, 0.0  ;;  %v1399_v21 = vperm.slane %v1282_v56, 4 }
 0x253   :  { %v452_v54 = vpop.f32.mrf.mxu3 }
 0x254   :  { %v453_v59 = vadd.f32 %v452_v54, %v1376_v5 }
 0x255   :  { %v427_v17 = vpop.f32.mrf.mxu1 }
 0x256   :  { %v428_v23 = vadd.f32 %v427_v17, %v1376_v5  ;;  %v480_v61 = vmax.f32 %v453_v59, 0.0 }
 0x258   :  { %v470_v27 = vmax.f32 %v428_v23, 0.0  ;;  %v492_v62 = vpack.c.bf16 %v480_v61, %v479_v25  ;;  %v707_v25 = vrot.slane %v1249_v1, 2 }
 0x25a   :  { %v487_v28 = vpack.c.bf16 %v470_v27, %v469_v26 }
 0x25b   :  { %v455_v58 = vpop.f32.mrf.mxu3 }
 0x25c   :  { %562 = vmatmul.bf16.gmra.mxu0 %v487_v28  ;;  %v456_v2 = vadd.f32 %v455_v58, %v1376_v5  ;;  %v706_v58 = vrot.slane %v1249_v1, 1 }
 0x25d   :  { %v430_v29 = vpop.f32.mrf.mxu1 }
 0x25e   :  { %v431_v30 = vadd.f32 %v430_v29, %v1376_v5  ;;  %v481_v7 = vmax.f32 %v456_v2, 0.0  ;;  %v724_v2 = vperm.slane %v706_v58, 0 }
 0x260   :  { %v471_v33 = vmax.f32 %v431_v30, 0.0 }
 0x263   :  { %v457_v63 = vpop.f32.mrf.mxu3 }
 0x264   :  { %v458_v0 = vadd.f32 %v457_v63, %v1376_v5 }
 0x265   :  { %v432_v31 = vpop.f32.mrf.mxu1 }
 0x266   :  { %v433_v32 = vadd.f32 %v432_v31, %v1376_v5  ;;  %v482_v6 = vmax.f32 %v458_v0, 0.0 }
 0x268   :  { %v472_v34 = vmax.f32 %v433_v32, 0.0  ;;  %v493_v9 = vpack.c.bf16 %v482_v6, %v481_v7 }
 0x26a   :  { %v488_v35 = vpack.c.bf16 %v472_v34, %v471_v33 }
 0x26b   :  { %v460_v3 = vpop.f32.mrf.mxu3 }
 0x26c   :  { %567 = vmatmul.bf16.gmra.mxu0 %v488_v35  ;;  %v461_v13 = vadd.f32 %v460_v3, %v1376_v5  ;;  %v708_v3 = vrot.slane %v1249_v1, 3 }
 0x26d   :  { %v435_v36 = vpop.f32.mrf.mxu1 }
 0x26e   :  { %v436_v37 = vadd.f32 %v435_v36, %v1376_v5  ;;  %v483_v15 = vmax.f32 %v461_v13, 0.0 }
 0x270   :  { %v473_v39 = vmax.f32 %v436_v37, 0.0 }
 0x273   :  { %v462_v10 = vpop.f32.mrf.mxu3 }
 0x274   :  { %v463_v12 = vadd.f32 %v462_v10, %v1376_v5 }
 0x275   :  { %v437_v38 = vpop.f32.mrf.mxu1 }
 0x276   :  { %v438_v22 = vadd.f32 %v437_v38, %v1376_v5  ;;  %v484_v14 = vmax.f32 %v463_v12, 0.0  ;;  %v725_v12 = vperm.slane %v707_v25, 0 }
 0x278   :  { %v474_v40 = vmax.f32 %v438_v22, 0.0  ;;  %v494_v18 = vpack.c.bf16 %v484_v14, %v483_v15  ;;  %v710_v15 = vrot.slane %v1249_v1, 5 }
 0x27a   :  { %v489_v42 = vpack.c.bf16 %v474_v40, %v473_v39 }
 0x27c   :  { %572 = vmatmul.bf16.vlgmr.msra.gmra.mxu2 %v489_v42 }
 0x27d   :  { %v440_v43 = vpop.f32.mrf.mxu1 }
 0x27e   :  { %v441_v45 = vadd.f32 %v440_v43, %v1376_v5 }
 0x280   :  { %v475_v48 = vmax.f32 %v441_v45, 0.0 }
 0x285   :  { %v442_v46 = vpop.f32.mrf.mxu1 }
 0x286   :  { %v443_v47 = vadd.f32 %v442_v46, %v1376_v5 }
 0x288   :  { %v476_v49 = vmax.f32 %v443_v47, 0.0 }
 0x28a   :  { %v490_v50 = vpack.c.bf16 %v476_v49, %v475_v48 }
 0x28c   :  { %577 = vmatmul.bf16.gmra.mxu2 %v490_v50 }
 0x29c   :  { %582 = vmatmul.bf16.gmra.mxu2 %v491_v57 }
 0x2ac   :  { %587 = vmatmul.bf16.gmra.mxu2 %v492_v62 }
 0x2b9   :  { %v553_v8 = vpop.f32.mrf.mxu0 }
 0x2ba   :  { %v554_v26 = vadd.f32 %v553_v8, %v1399_v21  ;;  %v709_v8 = vrot.slane %v1249_v1, 4 }
 0x2bc   :  { %592 = vmatmul.bf16.gmra.mxu2 %v493_v9  ;;  %v603_v29 = vsub.f32 0.0, %v554_v26 }
 0x2be   :  { %v623_v35 = vmul.f32 1.442695, %v603_v29 }
 0x2c1   :  { %v555_v11 = vpop.f32.mrf.mxu0 }
 0x2c2   :  { %v556_v23 = vadd.f32 %v555_v11, %v1399_v21  ;;  %v723_v11 = vperm.slane %v1249_v1, 0 }
 0x2c4   :  { %v604_v28 = vsub.f32 0.0, %v556_v23 }
 0x2c6   :  { %v625_v33 = vmul.f32 1.442695, %v604_v28  ;;  %v711_v28 = vrot.slane %v1249_v1, 6 }
 0x2c8   :  { %1013 = vpow2.f32 %v625_v33  ;;  %v712_v33 = vrot.slane %v1249_v1, 7 }
 0x2c9   :  { %v558_v16 = vpop.f32.mrf.mxu0  ;;  %1015 = vpow2.f32 %v623_v35 }
 0x2ca   :  { %v559_v27 = vadd.f32 %v558_v16, %v1399_v21 }
 0x2cc   :  { %597 = vmatmul.bf16.gmra.mxu2 %v494_v18  ;;  %v605_v31 = vsub.f32 0.0, %v559_v27 }
 0x2ce   :  { %v627_v36 = vmul.f32 1.442695, %v605_v31  ;;  %v1014_v46 = vpop.eup %1013 }
 0x2cf   :  { %v1016_v48 = vpop.eup %1015  ;;  %v664_v51 = vadd.f32 1.0, %v1014_v46 }
 0x2d0   :  { %1017 = vpow2.f32 %v627_v36  ;;  %v663_v24 = vadd.f32 1.0, %v1016_v48 }
 0x2d1   :  { %v560_v19 = vpop.f32.mrf.mxu0 }
 0x2d2   :  { %v561_v5 = vadd.f32 %v560_v19, %v1399_v21  ;;  %v726_v19 = vperm.slane %v708_v3, 0 }
 0x2d4   :  { %v606_v34 = vsub.f32 0.0, %v561_v5 }
 0x2d6   :  { %v629_v22 = vmul.f32 1.442695, %v606_v34  ;;  %v1018_v49 = vpop.eup %1017 }
 0x2d7   :  { %v665_v53 = vadd.f32 1.0, %v1018_v49  ;;  %v731_v49 = vperm.slane %v1254_v4, 0 }
 0x2d8   :  { %1019 = vpow2.f32 %v629_v22 }
 0x2d9   :  { %v563_v20 = vpop.f32.mrf.mxu0 }
 0x2da   :  { %v564_v32 = vadd.f32 %v563_v20, %v1399_v21 }
 0x2dc   :  { %v607_v37 = vsub.f32 0.0, %v564_v32 }
 0x2de   :  { %v631_v41 = vmul.f32 1.442695, %v607_v37  ;;  %v1020_v52 = vpop.eup %1019 }
 0x2df   :  { %v666_v55 = vadd.f32 1.0, %v1020_v52 }
 0x2e0   :  { %1021 = vpow2.f32 %v631_v41 }
 0x2e1   :  { %v565_v17 = vpop.f32.mrf.mxu0 }
 0x2e2   :  { %v566_v56 = vadd.f32 %v565_v17, %v1399_v21  ;;  %v727_v17 = vperm.slane %v709_v8, 0 }
 0x2e4   :  { %v608_v39 = vsub.f32 0.0, %v566_v56 }
 0x2e6   :  { %v633_v44 = vmul.f32 1.442695, %v608_v39  ;;  %v1022_v54 = vpop.eup %1021 }
 0x2e7   :  { %v667_v59 = vadd.f32 1.0, %v1022_v54 }
 0x2e8   :  { %1023 = vpow2.f32 %v633_v44 }
 0x2e9   :  { %v568_v30 = vpop.f32.mrf.mxu0 }
 0x2ea   :  { %v569_v38 = vadd.f32 %v568_v30, %v1399_v21  ;;  %v728_v30 = vperm.slane %v710_v15, 0 }
 0x2ec   :  { %v609_v42 = vsub.f32 0.0, %v569_v38  ;;  %v729_v38 = vperm.slane %v711_v28, 0 }
 0x2ee   :  { %v635_v47 = vmul.f32 1.442695, %v609_v42  ;;  %v1024_v57 = vpop.eup %1023 }
 0x2ef   :  { %v668_v63 = vadd.f32 1.0, %v1024_v57 }
 0x2f0   :  { %1025 = vpow2.f32 %v635_v47 }
 0x2f1   :  { %v570_v40 = vpop.f32.mrf.mxu0 }
 0x2f2   :  { %v571_v43 = vadd.f32 %v570_v40, %v1399_v21 }
 0x2f4   :  { %v610_v45 = vsub.f32 0.0, %v571_v43  ;;  %v730_v43 = vperm.slane %v712_v33, 0 }
 0x2f6   :  { %v637_v50 = vmul.f32 1.442695, %v610_v45  ;;  %v1026_v61 = vpop.eup %1025 }
 0x2f7   :  { %v669_v9 = vadd.f32 1.0, %v1026_v61 }
 0x2f8   :  { %1027 = vpow2.f32 %v637_v50 }
 0x2f9   :  { %1029 = vrcp.f32 %v664_v51 }
 0x2fa   :  { %1031 = vrcp.f32 %v663_v24 }
 0x2fb   :  { %1033 = vrcp.f32 %v665_v53 }
 0x2fc   :  { %1035 = vrcp.f32 %v666_v55  ;;  %v713_v55 = vrot.slane %v1254_v4, 1 }
 0x2fd   :  { %1037 = vrcp.f32 %v667_v59 }
 0x2fe   :  { %v1028_v0 = vpop.eup %1027  ;;  %1039 = vrcp.f32 %v668_v63  ;;  %v732_v59 = vperm.slane %v713_v55, 0 }
 0x2ff   :  { %v573_v60 = vpop.f32.mrf.mxu2  ;;  %v1030_v7 = vpop.eup %1029  ;;  %v670_v16 = vadd.f32 1.0, %v1028_v0 }
 0x300   :  { %v574_v62 = vadd.f32 %v573_v60, %v1399_v21  ;;  %v1032_v10 = vpop.eup %1031  ;;  %v764_v18 = vmul.f32 %v1030_v7, %v724_v2 }
 0x301   :  { %v1034_v14 = vpop.eup %1033  ;;  %v763_v26 = vmul.f32 %v1032_v10, %v723_v11 }
 0x302   :  { %v611_v6 = vsub.f32 0.0, %v574_v62  ;;  %v1036_v20 = vpop.eup %1035  ;;  %v765_v27 = vmul.f32 %v1034_v14, %v725_v12 }
 0x303   :  { %v1038_v29 = vpop.eup %1037  ;;  %v783_v31 = vadd.f32 %v764_v18, %v763_v26  ;;  %v766_v32 = vmul.f32 %v1036_v20, %v726_v19 }
 0x304   :  { %v639_v13 = vmul.f32 1.442695, %v611_v6  ;;  %v1040_v56 = vpop.eup %1039  ;;  %v767_v37 = vmul.f32 %v1038_v29, %v727_v17 }
 0x305   :  { %v785_v36 = vadd.f32 %v783_v31, %v765_v27  ;;  %v768_v42 = vmul.f32 %v1040_v56, %v728_v30 }
 0x306   :  { %1041 = vpow2.f32 %v639_v13 }
 0x307   :  { %1043 = vrcp.f32 %v669_v9  ;;  %v575_v23 = vpop.f32.mrf.mxu2  ;;  %v787_v41 = vadd.f32 %v785_v36, %v766_v32 }
 0x308   :  { %v576_v5 = vadd.f32 %v575_v23, %v1399_v21  ;;  %1045 = vrcp.f32 %v670_v16 }
 0x309   :  { %v789_v46 = vadd.f32 %v787_v41, %v767_v37 }
 0x30a   :  { %v612_v34 = vsub.f32 0.0, %v576_v5 }
 0x30b   :  { %v791_v48 = vadd.f32 %v789_v46, %v768_v42 }
 0x30c   :  { %v1042_v35 = vpop.eup %1041  ;;  %v641_v22 = vmul.f32 1.442695, %v612_v34 }
 0x30d   :  { %v1044_v39 = vpop.eup %1043  ;;  %v671_v40 = vadd.f32 1.0, %v1042_v35 }
 0x30e   :  { %1047 = vpow2.f32 %v641_v22  ;;  %v1046_v44 = vpop.eup %1045  ;;  %v769_v47 = vmul.f32 %v1044_v39, %v729_v38 }
 0x30f   :  { %1049 = vrcp.f32 %v671_v40  ;;  %v578_v45 = vpop.f32.mrf.mxu2  ;;  %v770_v1 = vmul.f32 %v1046_v44, %v730_v43  ;;  %v1093_v44 = vld [vmem:[#allocation2 + $0x8] sm:$0xff] }
 0x310   :  { %v793_v51 = vadd.f32 %v791_v48, %v769_v47  ;;  %v579_v6 = vadd.f32 %v578_v45, %v1399_v21  ;;  %v715_v45 = vrot.slane %v1093_v44, 3 }
 0x312   :  { %v795_v53 = vadd.f32 %v793_v51, %v770_v1  ;;  %v613_v9 = vsub.f32 0.0, %v579_v6  ;;  %v714_v1 = vrot.slane %v1093_v44, 2 }
 0x314   :  { %v1048_v50 = vpop.eup %1047  ;;  %v643_v16 = vmul.f32 1.442695, %v613_v9 }
 0x315   :  { %v1050_v52 = vpop.eup %1049  ;;  %v672_v24 = vadd.f32 1.0, %v1048_v50 }
 0x316   :  { %v771_v54 = vmul.f32 %v1050_v52, %v731_v49  ;;  %v716_v49 = vrot.slane %v1093_v44, 4 }
 0x317   :  { %1051 = vrcp.f32 %v672_v24  ;;  %v580_v57 = vpop.f32.mrf.mxu2  ;;  %v734_v24 = vperm.slane %v715_v45, 0 }
 0x318   :  { %v797_v58 = vadd.f32 %v795_v53, %v771_v54  ;;  %v581_v3 = vadd.f32 %v580_v57, %v1399_v21  ;;  %v717_v53 = vrot.slane %v1093_v44, 5 }
 0x31a   :  { %v614_v8 = vsub.f32 0.0, %v581_v3  ;;  %v736_v6 = vperm.slane %v717_v53, 0 }
 0x31c   :  { %v645_v13 = vmul.f32 1.442695, %v614_v8 }
 0x31d   :  { %v1052_v60 = vpop.eup %1051 }
 0x31e   :  { %v772_v61 = vmul.f32 %v1052_v60, %v732_v59  ;;  %1053 = vpow2.f32 %v645_v13  ;;  %v733_v59 = vperm.slane %v714_v1, 0  ;;  %v735_v60 = vperm.slane %v716_v49, 0 }
 0x31f   :  { %v583_v25 = vpop.f32.mrf.mxu2  ;;  %1055 = vpow2.f32 %v643_v16  ;;  %v1094_v16 = vld [vmem:[#allocation2 + $0x10] sm:$0xf] }
 0x320   :  { %v1421_v62 = vadd.f32 %v797_v58, %v772_v61  ;;  %v584_v7 = vadd.f32 %v583_v25, %v1399_v21  ;;  %v718_v61 = vrot.slane %v1093_v44, 6 }
 0x322   :  { %v615_v11 = vsub.f32 0.0, %v584_v7  ;;  %v719_v7 = vrot.slane %v1093_v44, 7  ;;  %v832_v1 = vrot.slane %v1421_v62, 6  ;;  %v822_v49 = vrot.slane %v1421_v62, 4 }
 0x324   :  { %v647_v18 = vmul.f32 1.442695, %v615_v11  ;;  %v1054_v31 = vpop.eup %1053  ;;  %v737_v11 = vperm.slane %v718_v61, 0 }
 0x325   :  { %v1056_v33 = vpop.eup %1055  ;;  %v674_v35 = vadd.f32 1.0, %v1054_v31 }
 0x326   :  { %1057 = vpow2.f32 %v647_v18  ;;  %v673_v38 = vadd.f32 1.0, %v1056_v33  ;;  %v720_v18 = vrot.slane %v1094_v16, 1 }
 0x327   :  { %v585_v63 = vpop.f32.mrf.mxu2 }
 0x328   :  { %v586_v4 = vadd.f32 %v585_v63, %v1399_v21 }
 0x32a   :  { %v616_v14 = vsub.f32 0.0, %v586_v4 }
 0x32c   :  { %v649_v17 = vmul.f32 1.442695, %v616_v14  ;;  %v1058_v34 = vpop.eup %1057 }
 0x32d   :  { %v675_v39 = vadd.f32 1.0, %v1058_v34 }
 0x32e   :  { %1059 = vpow2.f32 %v649_v17 }
 0x32f   :  { %v588_v0 = vpop.f32.mrf.mxu2 }
 0x330   :  { %v589_v12 = vadd.f32 %v588_v0, %v1399_v21 }
 0x332   :  { %v617_v19 = vsub.f32 0.0, %v589_v12 }
 0x334   :  { %v651_v27 = vmul.f32 1.442695, %v617_v19  ;;  %v1060_v37 = vpop.eup %1059 }
 0x335   :  { %v676_v42 = vadd.f32 1.0, %v1060_v37 }
 0x336   :  { %1061 = vpow2.f32 %v651_v27 }
 0x337   :  { %v590_v2 = vpop.f32.mrf.mxu2 }
 0x338   :  { %v591_v15 = vadd.f32 %v590_v2, %v1399_v21 }
 0x33a   :  { %v618_v23 = vsub.f32 0.0, %v591_v15  ;;  %v738_v15 = vperm.slane %v719_v7, 0 }
 0x33c   :  { %v653_v29 = vmul.f32 1.442695, %v618_v23  ;;  %v1062_v40 = vpop.eup %1061  ;;  %v739_v23 = vperm.slane %v1094_v16, 0 }
 0x33d   :  { %v677_v47 = vadd.f32 1.0, %v1062_v40 }
 0x33e   :  { %1063 = vpow2.f32 %v653_v29 }
 0x33f   :  { %v593_v10 = vpop.f32.mrf.mxu2 }
 0x340   :  { %v594_v20 = vadd.f32 %v593_v10, %v1399_v21 }
 0x342   :  { %v619_v28 = vsub.f32 0.0, %v594_v20 }
 0x344   :  { %v655_v32 = vmul.f32 1.442695, %v619_v28  ;;  %v1064_v43 = vpop.eup %1063 }
 0x345   :  { %v678_v50 = vadd.f32 1.0, %v1064_v43 }
 0x346   :  { %1065 = vpow2.f32 %v655_v32 }
 0x347   :  { %v595_v26 = vpop.f32.mrf.mxu2 }
 0x348   :  { %v596_v5 = vadd.f32 %v595_v26, %v1399_v21  ;;  %v721_v26 = vrot.slane %v1094_v16, 2 }
 0x34a   :  { %v620_v30 = vsub.f32 0.0, %v596_v5 }
 0x34c   :  { %v657_v56 = vmul.f32 1.442695, %v620_v30  ;;  %v1066_v48 = vpop.eup %1065  ;;  %v740_v30 = vperm.slane %v720_v18, 0 }
 0x34d   :  { %v679_v57 = vadd.f32 1.0, %v1066_v48  ;;  %v816_v48 = vrot.slane %v1421_v62, 3 }
 0x34e   :  { %1067 = vpow2.f32 %v657_v56  ;;  %v741_v56 = vperm.slane %v721_v26, 0 }
 0x34f   :  { %v598_v36 = vpop.f32.mrf.mxu2  ;;  %1069 = vrcp.f32 %v674_v35  ;;  %v722_v35 = vrot.slane %v1094_v16, 3 }
 0x350   :  { %v599_v22 = vadd.f32 %v598_v36, %v1399_v21  ;;  %1071 = vrcp.f32 %v673_v38 }
 0x351   :  { %1073 = vrcp.f32 %v675_v39  ;;  %v742_v40 = vperm.slane %v722_v35, 0 }
 0x352   :  { %v621_v41 = vsub.f32 0.0, %v599_v22 }
 0x354   :  { %v659_v46 = vmul.f32 1.442695, %v621_v41  ;;  %v1068_v52 = vpop.eup %1067 }
 0x355   :  { %v1070_v55 = vpop.eup %1069  ;;  %v680_v0 = vadd.f32 1.0, %v1068_v52 }
 0x356   :  { %1075 = vpow2.f32 %v659_v46  ;;  %v1072_v58 = vpop.eup %1071  ;;  %v774_v3 = vmul.f32 %v1070_v55, %v734_v24  ;;  %v836_v46 = vrot.slane %v1421_v62, 7 }
 0x357   :  { %1077 = vrcp.f32 %v676_v42  ;;  %v600_v51 = vpop.f32.mrf.mxu2  ;;  %v1074_v63 = vpop.eup %1073 }
 0x358   :  { %v601_v54 = vadd.f32 %v600_v51, %v1399_v21  ;;  %1079 = vrcp.f32 %v677_v47  ;;  %v773_v21 = vmul.f32 %v1072_v58, %v733_v59  ;;  %v775_v10 = vmul.f32 %v1074_v63, %v735_v60 }
 0x359   :  { %1081 = vrcp.f32 %v678_v50  ;;  %v826_v47 = vrot.slane %v1421_v62, 5  ;;  %v812_v50 = vrot.slane %v1421_v62, 2 }
 0x35a   :  { %v622_v25 = vsub.f32 0.0, %v601_v54  ;;  %1083 = vrcp.f32 %v679_v57  ;;  %v784_v13 = vadd.f32 %v774_v3, %v773_v21 }
 0x35c   :  { %v1076_v2 = vpop.eup %1075  ;;  %v661_v8 = vmul.f32 1.442695, %v622_v25  ;;  %v786_v20 = vadd.f32 %v784_v13, %v775_v10 }
 0x35d   :  { %v1078_v4 = vpop.eup %1077  ;;  %v681_v9 = vadd.f32 1.0, %v1076_v2  ;;  %v807_v2 = vrot.slane %v1421_v62, 1 }
 0x35e   :  { %1085 = vpow2.f32 %v661_v8  ;;  %v1080_v12 = vpop.eup %1079  ;;  %v776_v14 = vmul.f32 %v1078_v4, %v736_v6 }
 0x35f   :  { %1087 = vrcp.f32 %v680_v0  ;;  %v1082_v19 = vpop.eup %1081  ;;  %v777_v17 = vmul.f32 %v1080_v12, %v737_v11 }
 0x360   :  { %1089 = vrcp.f32 %v681_v9  ;;  %v1084_v27 = vpop.eup %1083  ;;  %v788_v5 = vadd.f32 %v786_v20, %v776_v14  ;;  %v778_v29 = vmul.f32 %v1082_v19, %v738_v15 }
 0x361   :  { %v779_v34 = vmul.f32 %v1084_v27, %v739_v23 }
 0x362   :  { %v790_v33 = vadd.f32 %v788_v5, %v777_v17 }
 0x364   :  { %v1086_v28 = vpop.eup %1085  ;;  %v792_v37 = vadd.f32 %v790_v33, %v778_v29 }
 0x365   :  { %v1088_v31 = vpop.eup %1087  ;;  %v682_v32 = vadd.f32 1.0, %v1086_v28 }
 0x366   :  { %v1090_v36 = vpop.eup %1089  ;;  %v780_v38 = vmul.f32 %v1088_v31, %v740_v30  ;;  %v794_v22 = vadd.f32 %v792_v37, %v779_v34 }
 0x367   :  { %1091 = vrcp.f32 %v682_v32  ;;  %v781_v39 = vmul.f32 %v1090_v36, %v741_v56 }
 0x368   :  { %v796_v41 = vadd.f32 %v794_v22, %v780_v38 }
 0x36a   :  { %v798_v43 = vadd.f32 %v796_v41, %v781_v39 }
 0x36d   :  { %v1092_v42 = vpop.eup %1091 }
 0x36e   :  { %v782_v44 = vmul.f32 %v1092_v42, %v742_v40 }
 0x370   :  { %v800_v45 = vadd.f32 %v798_v43, %v782_v44 }
 0x372   :  { %v837_v51 = vrot.slane %v800_v45, 6  ;;  %v827_v52 = vrot.slane %v800_v45, 4  ;;  %v817_v24 = vrot.slane %v800_v45, 2  ;;  %v833_v53 = vrot.slane %v800_v45, 5 }
 0x373   :  { %v823_v54 = vrot.slane %v800_v45, 3  ;;  %v813_v55 = vrot.slane %v800_v45, 1  ;;  %v803_v57 = vrot.slane %v800_v45, 7  ;;  %v808_v3 = vsel %vm804_vm12, %v800_v45, %v807_v2 }
 0x374   :  { %v838_v58 = vsel %vm804_vm12, %v837_v51, %v836_v46  ;;  %v828_v59 = vsel %vm804_vm12, %v827_v52, %v826_v47  ;;  %v818_v60 = vsel %vm804_vm12, %v817_v24, %v816_v48  ;;  %v834_v61 = vsel %vm804_vm12, %v833_v53, %v832_v1 }
 0x375   :  { %839 = vrot.lane.b32.xlu2 %v838_v58, %s1203_s4  ;;  %829 = vrot.lane.b32.xlu1 %v828_v59, %s1203_s4  ;;  %v824_v25 = vsel %vm804_vm12, %v823_v54, %v822_v49  ;;  %v814_v63 = vsel %vm804_vm12, %v813_v55, %v812_v50  ;;  %v805_v0 = vsel %vm804_vm12, %v803_v57, %v1421_v62 }
 0x376   :  { %819 = vrot.lane.b32.xlu0 %v818_v60, %s1203_s4 }
 0x37e   :  { %809 = vrot.lane.b32.xlu0 %v808_v3, %s1203_s4 }
 0x3cf   :  { %v840_v6 = vpop.permute.xlu2 %839 }
 0x3d0   :  { %v845_v7 = vsel %vm113_vm1, %v834_v61, %v840_v6 }
 0x3d1   :  { %v852_v21 = vrot.slane %v845_v7, 2 }
 0x3e7   :  { %v830_v8 = vpop.permute.xlu1 %829 }
 0x3e8   :  { %v844_v4 = vsel %vm113_vm1, %v824_v25, %v830_v8  ;;  %v820_v9 = vpop.permute.xlu0 %819 }
 0x3e9   :  { %v851_v10 = vrot.slane %v844_v4, 4  ;;  %v843_v12 = vsel %vm113_vm1, %v814_v63, %v820_v9 }
 0x3ea   :  { %v850_v62 = vrot.slane %v843_v12, 6 }
 0x3eb   :  { %v856_v11 = vsel %vm855_vm13, %v851_v10, %v852_v21 }
 0x3f0   :  { %v810_v13 = vpop.permute.xlu0 %809 }
 0x3f1   :  { %v842_v14 = vsel %vm113_vm1, %v805_v0, %v810_v13 }
 0x3f2   :  { %v854_v15 = vsel %vm853_vm14, %v842_v14, %v850_v62 }
 0x3f3   :  { %v858_v16 = vsel %vm857_vm15, %v854_v15, %v856_v11 }
 0x3f4   :  { %860 = vst [vmem:[#allocation8] sm:$0xff] %v858_v16 }
 0x3f5   :  { %871 = dma.vmem_to_hbm [thread:$0]  %s867_s22, 128, %s869_s25, [#allocation4]  }
 0x3f6   :  { %1195 = dma.done.wait [#allocation4], 128  }
 0x3f7   :  { %1196 = vsyncadd [#allocation4], 4294967168 }
 0x3f8   :  { %876 = vsyncpa [#allocation3], 1 }
 0x3f9   :  { %877 = vsyncpa [#allocation6], 1 }
 0x3fa   :  { %878 = vsyncpa [#allocation4], 1 }

</bundles_post_ra>
